<compile_context>
chip_gen: v7x
topology: tpu7x:2x2x1
jax: 0.10.0
libtpu: 0.0.40
codegen_flags: <defaults>
</compile_context>

<pallas_src>
import jax
import jax.numpy as jnp
from jax import lax
from jax.experimental import pallas as pl
from jax.experimental.pallas import tpu as pltpu

BP = 8  # padded batch / sublane width


def _lstm_kernel(x_ref,        # (T*BP, I)   time-major, batch padded to 8
                 wih0_ref,     # (I, 4H)
                 b0_ref,       # (1, 4H)     b_ih0 + b_hh0
                 wbig_ref,     # (2H, 8H)    [[Whh0, Wih1], [0, Whh1]]
                 b1_ref,       # (1, 4H)     b_ih1 + b_hh1
                 wfc_ref,      # (H, 1)
                 bfc_ref,      # (1, 1)
                 out_ref):     # (BP, 1)
    Bp = out_ref.shape[0]                     # 8
    H = wbig_ref.shape[0] // 2
    H4 = 4 * H
    T = x_ref.shape[0] // Bp

    # ---- hoisted weight/bias loads (once, off the recurrence path) ----
    wbig = wbig_ref[...]                                     # (2H, 8H)
    b1 = jnp.broadcast_to(b1_ref[...], (Bp, H4))             # (Bp, 4H)

    # ---- layer-0 input projection for ALL timesteps (bias folded) ----
    # One (T*Bp, I) @ (I, 4H) MXU pass instead of T tiny matmuls.
    xproj = (jnp.dot(x_ref[...], wih0_ref[...],
                     preferred_element_type=jnp.float32)
             + b0_ref[...])                                   # (T*Bp, 4H)

    def activate(gates, c_prev):
        # One full-width sigmoid over (Bp, 4H) covers i/f/o; one tanh for g.
        # PyTorch gate order (i, f, g, o).
        sig = jax.nn.sigmoid(gates)
        i = sig[:, 0 * H:1 * H]
        f = sig[:, 1 * H:2 * H]
        o = sig[:, 3 * H:4 * H]
        g = jnp.tanh(gates[:, 2 * H:3 * H])
        c_new = f * c_prev + i * g
        h_new = o * jnp.tanh(c_new)
        return h_new, c_new

    zeros_h = jnp.zeros((Bp, H), jnp.float32)
    c0, h1, c1 = zeros_h, zeros_h, zeros_h
    g0_rec = jnp.zeros((Bp, H4), jnp.float32)   # h0(0) @ Whh0 = 0

    # Fully unrolled recurrence (T small & static); state stays in vregs.
    for t in range(T):
        # layer 0: recurrent term was produced by last step's fused matmul
        g0 = xproj[t * Bp:(t + 1) * Bp, :] + g0_rec           # whole-tile slice
        h0, c0 = activate(g0, c0)
        # single fused matmul: [h0(t) | h1(t-1)] @ [[Whh0, Wih1], [0, Whh1]]
        fused = jnp.dot(jnp.concatenate([h0, h1], axis=1), wbig,
                        preferred_element_type=jnp.float32)   # (Bp, 8H)
        g0_rec = fused[:, :H4]          # layer-0 recurrent gates for step t+1
        g1 = fused[:, H4:] + b1         # slice at 128-lane (vreg) boundary
        h1, c1 = activate(g1, c1)

    # fc on the last timestep's top-layer hidden state
    out_ref[...] = (jnp.dot(h1, wfc_ref[...],
                            preferred_element_type=jnp.float32)
                    + bfc_ref[...])


def lstm_model_forward(x, params):
    """x: (B, T, I) float32  ->  (B, 1) float32"""
    B, T, I = x.shape
    H = params["whh0"].shape[0]

    # ---- layout plumbing only (no compute hoisted out of the kernel) ----
    # pad batch (sublane) dim to 8 and flatten time-major
    xp = jnp.zeros((BP, T, I), x.dtype).at[:B].set(x)
    x2d = jnp.transpose(xp, (1, 0, 2)).reshape(T * BP, I)     # (T*BP, I)
    # fused recurrent weight: [h0 | h1] @ [[Whh0, Wih1], [0, Whh1]]
    w_big = jnp.concatenate(
        [jnp.concatenate([params["whh0"], params["wih1"]], axis=1),
         jnp.concatenate([jnp.zeros_like(params["whh1"]), params["whh1"]],
                         axis=1)],
        axis=0)                                               # (2H, 8H)

    vmem = pl.BlockSpec(memory_space=pltpu.MemorySpace.VMEM)

    out = pl.pallas_call(
        _lstm_kernel,
        out_shape=jax.ShapeDtypeStruct((BP, 1), jnp.float32),
        in_specs=[vmem] * 7,
        out_specs=vmem,
    )(x2d,
      params["wih0"], params["b0"],
      w_big, params["b1"],
      params["wfc"], params["bfc"])
    return out[:B]


def init_params(key, input_size, hidden_size):
    """Deterministic init mirroring PyTorch shapes; weights stored pre-transposed."""
    H = hidden_size
    k = 1.0 / jnp.sqrt(jnp.float32(H))
    keys = jax.random.split(key, 10)
    u = lambda kk, shape: jax.random.uniform(kk, shape, jnp.float32, -k, k)
    # layer 0: W_ih (4H, I) -> transposed (I, 4H); W_hh (4H, H) -> (H, 4H)
    wih0 = u(keys[0], (input_size, 4 * H))
    whh0 = u(keys[1], (H, 4 * H))
    b0 = u(keys[2], (1, 4 * H)) + u(keys[3], (1, 4 * H))   # b_ih + b_hh
    # layer 1: input is hidden of layer 0
    wih1 = u(keys[4], (H, 4 * H))
    whh1 = u(keys[5], (H, 4 * H))
    b1 = u(keys[6], (1, 4 * H)) + u(keys[7], (1, 4 * H))
    # fc: Linear(H, 1): weight (1, H) -> transposed (H, 1); bias (1,)
    wfc = u(keys[8], (H, 1))
    bfc = u(keys[9], (1, 1))
    return dict(wih0=wih0, whh0=whh0, b0=b0,
                wih1=wih1, whh1=whh1, b1=b1,
                wfc=wfc, bfc=bfc)


def reference_forward(x, params):
    """Pure-JAX reference of the PyTorch forward (for correctness check)."""
    B, T, I = x.shape
    H = params["whh0"].shape[0]

    def cell(x_t, h, c, wih, whh, b):
        g = x_t @ wih + h @ whh + b
        i = jax.nn.sigmoid(g[:, 0 * H:1 * H])
        f = jax.nn.sigmoid(g[:, 1 * H:2 * H])
        gg = jnp.tanh(g[:, 2 * H:3 * H])
        o = jax.nn.sigmoid(g[:, 3 * H:4 * H])
        c = f * c + i * gg
        h = o * jnp.tanh(c)
        return h, c

    def scan_fn(carry, x_t):
        h0, c0, h1, c1 = carry
        h0, c0 = cell(x_t, h0, c0, params["wih0"], params["whh0"], params["b0"])
        h1, c1 = cell(h0, h1, c1, params["wih1"], params["whh1"], params["b1"])
        return (h0, c0, h1, c1), h1

    z = jnp.zeros((B, H), jnp.float32)
    (_, _, h1, _), _ = lax.scan(scan_fn, (z, z, z, z),
                                jnp.transpose(x, (1, 0, 2)))
    return h1 @ params["wfc"] + params["bfc"]


if __name__ == "__main__":
    B, T, I, H = 2, 8, 4, 32   # batch, seq_len, input_size, hidden_size
    key = jax.random.PRNGKey(0)
    kx, kp = jax.random.split(key)
    x = jax.random.normal(kx, (B, T, I), jnp.float32)
    params = init_params(kp, I, H)

    out = lstm_model_forward(x, params)
    out = jax.block_until_ready(out)

    ref = reference_forward(x, params)
    assert out.shape == (B, 1)
    assert jnp.allclose(out, ref, atol=1e-4, rtol=1e-4), (out, ref)
    print("KERNEL_OK")
</pallas_src>

<mosaic_0001>
module attributes {stable_mosaic.version = 11 : i64} {
  func.func @_lstm_kernel(%arg0: memref<64x4xf32, #tpu.memory_space<vmem>>, %arg1: memref<4x128xf32, #tpu.memory_space<vmem>>, %arg2: memref<1x128xf32, #tpu.memory_space<vmem>>, %arg3: memref<64x256xf32, #tpu.memory_space<vmem>>, %arg4: memref<1x128xf32, #tpu.memory_space<vmem>>, %arg5: memref<32x1xf32, #tpu.memory_space<vmem>>, %arg6: memref<1x1xf32, #tpu.memory_space<vmem>>, %arg7: memref<8x1xf32, #tpu.memory_space<vmem>>) attributes {dimension_semantics = [], scalar_prefetch = 0 : i64, scratch_operands = 0 : i64, tpu.core_type = #tpu.core_type<tc>} {
    %c0 = arith.constant 0 : index
    %c0_0 = arith.constant 0 : index
    %0 = vector.load %arg3[%c0, %c0_0] : memref<64x256xf32, #tpu.memory_space<vmem>>, vector<64x256xf32>
    %c0_1 = arith.constant 0 : index
    %c0_2 = arith.constant 0 : index
    %1 = vector.load %arg4[%c0_1, %c0_2] : memref<1x128xf32, #tpu.memory_space<vmem>>, vector<1x128xf32>
    %2 = vector.shape_cast %1 : vector<1x128xf32> to vector<1x128xf32>
    %3 = vector.broadcast %2 : vector<1x128xf32> to vector<8x128xf32>
    %c0_3 = arith.constant 0 : index
    %c0_4 = arith.constant 0 : index
    %4 = vector.load %arg0[%c0_3, %c0_4] : memref<64x4xf32, #tpu.memory_space<vmem>>, vector<64x4xf32>
    %c0_5 = arith.constant 0 : index
    %c0_6 = arith.constant 0 : index
    %5 = vector.load %arg1[%c0_5, %c0_6] : memref<4x128xf32, #tpu.memory_space<vmem>>, vector<4x128xf32>
    %cst = arith.constant dense<0.000000e+00> : vector<64x128xf32>
    %6 = tpu.matmul %4, %5, %cst {dimension_numbers = #tpu.dot_dimension_numbers<[1], [0], [0], [1], [0, 0, 1, 1], [], []>} : vector<64x4xf32>, vector<4x128xf32>, vector<64x128xf32> -> vector<64x128xf32>
    %c0_7 = arith.constant 0 : index
    %c0_8 = arith.constant 0 : index
    %7 = vector.load %arg2[%c0_7, %c0_8] : memref<1x128xf32, #tpu.memory_space<vmem>>, vector<1x128xf32>
    %8 = vector.broadcast %7 : vector<1x128xf32> to vector<64x128xf32>
    %9 = arith.addf %6, %8 : vector<64x128xf32>
    %cst_9 = arith.constant 0.000000e+00 : f32
    %10 = vector.broadcast %cst_9 : f32 to vector<8x32xf32>
    %cst_10 = arith.constant 0.000000e+00 : f32
    %11 = vector.broadcast %cst_10 : f32 to vector<8x128xf32>
    %12 = vector.extract_strided_slice %9 {offsets = [0, 0], sizes = [8, 128], strides = [1, 1]} : vector<64x128xf32> to vector<8x128xf32>
    %13 = arith.addf %12, %11 : vector<8x128xf32>
    %14 = arith.negf %13 : vector<8x128xf32>
    %15 = math.exp %14 : vector<8x128xf32>
    %cst_11 = arith.constant 1.000000e+00 : f32
    %16 = vector.broadcast %cst_11 : f32 to vector<8x128xf32>
    %17 = arith.addf %16, %15 : vector<8x128xf32>
    %18 = arith.divf %16, %17 : vector<8x128xf32>
    %19 = vector.extract_strided_slice %18 {offsets = [0, 0], sizes = [8, 32], strides = [1, 1]} : vector<8x128xf32> to vector<8x32xf32>
    %20 = vector.extract_strided_slice %18 {offsets = [0, 32], sizes = [8, 32], strides = [1, 1]} : vector<8x128xf32> to vector<8x32xf32>
    %21 = vector.extract_strided_slice %18 {offsets = [0, 96], sizes = [8, 32], strides = [1, 1]} : vector<8x128xf32> to vector<8x32xf32>
    %22 = vector.extract_strided_slice %13 {offsets = [0, 64], sizes = [8, 32], strides = [1, 1]} : vector<8x128xf32> to vector<8x32xf32>
    %23 = math.tanh %22 : vector<8x32xf32>
    %24 = arith.mulf %20, %10 : vector<8x32xf32>
    %25 = arith.mulf %19, %23 : vector<8x32xf32>
    %26 = arith.addf %24, %25 : vector<8x32xf32>
    %27 = math.tanh %26 : vector<8x32xf32>
    %28 = arith.mulf %21, %27 : vector<8x32xf32>
    %29 = tpu.concatenate %28, %10 in 1 : vector<8x32xf32>, vector<8x32xf32> -> vector<8x64xf32>
    %cst_12 = arith.constant dense<0.000000e+00> : vector<8x256xf32>
    %30 = tpu.matmul %29, %0, %cst_12 {dimension_numbers = #tpu.dot_dimension_numbers<[1], [0], [0], [1], [0, 0, 1, 1], [], []>} : vector<8x64xf32>, vector<64x256xf32>, vector<8x256xf32> -> vector<8x256xf32>
    %31 = vector.extract_strided_slice %30 {offsets = [0, 0], sizes = [8, 128], strides = [1, 1]} : vector<8x256xf32> to vector<8x128xf32>
    %32 = vector.extract_strided_slice %30 {offsets = [0, 128], sizes = [8, 128], strides = [1, 1]} : vector<8x256xf32> to vector<8x128xf32>
    %33 = arith.addf %32, %3 : vector<8x128xf32>
    %34 = arith.negf %33 : vector<8x128xf32>
    %35 = math.exp %34 : vector<8x128xf32>
    %cst_13 = arith.constant 1.000000e+00 : f32
    %36 = vector.broadcast %cst_13 : f32 to vector<8x128xf32>
    %37 = arith.addf %36, %35 : vector<8x128xf32>
    %38 = arith.divf %36, %37 : vector<8x128xf32>
    %39 = vector.extract_strided_slice %38 {offsets = [0, 0], sizes = [8, 32], strides = [1, 1]} : vector<8x128xf32> to vector<8x32xf32>
    %40 = vector.extract_strided_slice %38 {offsets = [0, 32], sizes = [8, 32], strides = [1, 1]} : vector<8x128xf32> to vector<8x32xf32>
    %41 = vector.extract_strided_slice %38 {offsets = [0, 96], sizes = [8, 32], strides = [1, 1]} : vector<8x128xf32> to vector<8x32xf32>
    %42 = vector.extract_strided_slice %33 {offsets = [0, 64], sizes = [8, 32], strides = [1, 1]} : vector<8x128xf32> to vector<8x32xf32>
    %43 = math.tanh %42 : vector<8x32xf32>
    %44 = arith.mulf %40, %10 : vector<8x32xf32>
    %45 = arith.mulf %39, %43 : vector<8x32xf32>
    %46 = arith.addf %44, %45 : vector<8x32xf32>
    %47 = math.tanh %46 : vector<8x32xf32>
    %48 = arith.mulf %41, %47 : vector<8x32xf32>
    %49 = vector.extract_strided_slice %9 {offsets = [8, 0], sizes = [8, 128], strides = [1, 1]} : vector<64x128xf32> to vector<8x128xf32>
    %50 = arith.addf %49, %31 : vector<8x128xf32>
    %51 = arith.negf %50 : vector<8x128xf32>
    %52 = math.exp %51 : vector<8x128xf32>
    %cst_14 = arith.constant 1.000000e+00 : f32
    %53 = vector.broadcast %cst_14 : f32 to vector<8x128xf32>
    %54 = arith.addf %53, %52 : vector<8x128xf32>
    %55 = arith.divf %53, %54 : vector<8x128xf32>
    %56 = vector.extract_strided_slice %55 {offsets = [0, 0], sizes = [8, 32], strides = [1, 1]} : vector<8x128xf32> to vector<8x32xf32>
    %57 = vector.extract_strided_slice %55 {offsets = [0, 32], sizes = [8, 32], strides = [1, 1]} : vector<8x128xf32> to vector<8x32xf32>
    %58 = vector.extract_strided_slice %55 {offsets = [0, 96], sizes = [8, 32], strides = [1, 1]} : vector<8x128xf32> to vector<8x32xf32>
    %59 = vector.extract_strided_slice %50 {offsets = [0, 64], sizes = [8, 32], strides = [1, 1]} : vector<8x128xf32> to vector<8x32xf32>
    %60 = math.tanh %59 : vector<8x32xf32>
    %61 = arith.mulf %57, %26 : vector<8x32xf32>
    %62 = arith.mulf %56, %60 : vector<8x32xf32>
    %63 = arith.addf %61, %62 : vector<8x32xf32>
    %64 = math.tanh %63 : vector<8x32xf32>
    %65 = arith.mulf %58, %64 : vector<8x32xf32>
    %66 = tpu.concatenate %65, %48 in 1 : vector<8x32xf32>, vector<8x32xf32> -> vector<8x64xf32>
    %cst_15 = arith.constant dense<0.000000e+00> : vector<8x256xf32>
    %67 = tpu.matmul %66, %0, %cst_15 {dimension_numbers = #tpu.dot_dimension_numbers<[1], [0], [0], [1], [0, 0, 1, 1], [], []>} : vector<8x64xf32>, vector<64x256xf32>, vector<8x256xf32> -> vector<8x256xf32>
    %68 = vector.extract_strided_slice %67 {offsets = [0, 0], sizes = [8, 128], strides = [1, 1]} : vector<8x256xf32> to vector<8x128xf32>
    %69 = vector.extract_strided_slice %67 {offsets = [0, 128], sizes = [8, 128], strides = [1, 1]} : vector<8x256xf32> to vector<8x128xf32>
    %70 = arith.addf %69, %3 : vector<8x128xf32>
    %71 = arith.negf %70 : vector<8x128xf32>
    %72 = math.exp %71 : vector<8x128xf32>
    %cst_16 = arith.constant 1.000000e+00 : f32
    %73 = vector.broadcast %cst_16 : f32 to vector<8x128xf32>
    %74 = arith.addf %73, %72 : vector<8x128xf32>
    %75 = arith.divf %73, %74 : vector<8x128xf32>
    %76 = vector.extract_strided_slice %75 {offsets = [0, 0], sizes = [8, 32], strides = [1, 1]} : vector<8x128xf32> to vector<8x32xf32>
    %77 = vector.extract_strided_slice %75 {offsets = [0, 32], sizes = [8, 32], strides = [1, 1]} : vector<8x128xf32> to vector<8x32xf32>
    %78 = vector.extract_strided_slice %75 {offsets = [0, 96], sizes = [8, 32], strides = [1, 1]} : vector<8x128xf32> to vector<8x32xf32>
    %79 = vector.extract_strided_slice %70 {offsets = [0, 64], sizes = [8, 32], strides = [1, 1]} : vector<8x128xf32> to vector<8x32xf32>
    %80 = math.tanh %79 : vector<8x32xf32>
    %81 = arith.mulf %77, %46 : vector<8x32xf32>
    %82 = arith.mulf %76, %80 : vector<8x32xf32>
    %83 = arith.addf %81, %82 : vector<8x32xf32>
    %84 = math.tanh %83 : vector<8x32xf32>
    %85 = arith.mulf %78, %84 : vector<8x32xf32>
    %86 = vector.extract_strided_slice %9 {offsets = [16, 0], sizes = [8, 128], strides = [1, 1]} : vector<64x128xf32> to vector<8x128xf32>
    %87 = arith.addf %86, %68 : vector<8x128xf32>
    %88 = arith.negf %87 : vector<8x128xf32>
    %89 = math.exp %88 : vector<8x128xf32>
    %cst_17 = arith.constant 1.000000e+00 : f32
    %90 = vector.broadcast %cst_17 : f32 to vector<8x128xf32>
    %91 = arith.addf %90, %89 : vector<8x128xf32>
    %92 = arith.divf %90, %91 : vector<8x128xf32>
    %93 = vector.extract_strided_slice %92 {offsets = [0, 0], sizes = [8, 32], strides = [1, 1]} : vector<8x128xf32> to vector<8x32xf32>
    %94 = vector.extract_strided_slice %92 {offsets = [0, 32], sizes = [8, 32], strides = [1, 1]} : vector<8x128xf32> to vector<8x32xf32>
    %95 = vector.extract_strided_slice %92 {offsets = [0, 96], sizes = [8, 32], strides = [1, 1]} : vector<8x128xf32> to vector<8x32xf32>
    %96 = vector.extract_strided_slice %87 {offsets = [0, 64], sizes = [8, 32], strides = [1, 1]} : vector<8x128xf32> to vector<8x32xf32>
    %97 = math.tanh %96 : vector<8x32xf32>
    %98 = arith.mulf %94, %63 : vector<8x32xf32>
    %99 = arith.mulf %93, %97 : vector<8x32xf32>
    %100 = arith.addf %98, %99 : vector<8x32xf32>
    %101 = math.tanh %100 : vector<8x32xf32>
    %102 = arith.mulf %95, %101 : vector<8x32xf32>
    %103 = tpu.concatenate %102, %85 in 1 : vector<8x32xf32>, vector<8x32xf32> -> vector<8x64xf32>
    %cst_18 = arith.constant dense<0.000000e+00> : vector<8x256xf32>
    %104 = tpu.matmul %103, %0, %cst_18 {dimension_numbers = #tpu.dot_dimension_numbers<[1], [0], [0], [1], [0, 0, 1, 1], [], []>} : vector<8x64xf32>, vector<64x256xf32>, vector<8x256xf32> -> vector<8x256xf32>
    %105 = vector.extract_strided_slice %104 {offsets = [0, 0], sizes = [8, 128], strides = [1, 1]} : vector<8x256xf32> to vector<8x128xf32>
    %106 = vector.extract_strided_slice %104 {offsets = [0, 128], sizes = [8, 128], strides = [1, 1]} : vector<8x256xf32> to vector<8x128xf32>
    %107 = arith.addf %106, %3 : vector<8x128xf32>
    %108 = arith.negf %107 : vector<8x128xf32>
    %109 = math.exp %108 : vector<8x128xf32>
    %cst_19 = arith.constant 1.000000e+00 : f32
    %110 = vector.broadcast %cst_19 : f32 to vector<8x128xf32>
    %111 = arith.addf %110, %109 : vector<8x128xf32>
    %112 = arith.divf %110, %111 : vector<8x128xf32>
    %113 = vector.extract_strided_slice %112 {offsets = [0, 0], sizes = [8, 32], strides = [1, 1]} : vector<8x128xf32> to vector<8x32xf32>
    %114 = vector.extract_strided_slice %112 {offsets = [0, 32], sizes = [8, 32], strides = [1, 1]} : vector<8x128xf32> to vector<8x32xf32>
    %115 = vector.extract_strided_slice %112 {offsets = [0, 96], sizes = [8, 32], strides = [1, 1]} : vector<8x128xf32> to vector<8x32xf32>
    %116 = vector.extract_strided_slice %107 {offsets = [0, 64], sizes = [8, 32], strides = [1, 1]} : vector<8x128xf32> to vector<8x32xf32>
    %117 = math.tanh %116 : vector<8x32xf32>
    %118 = arith.mulf %114, %83 : vector<8x32xf32>
    %119 = arith.mulf %113, %117 : vector<8x32xf32>
    %120 = arith.addf %118, %119 : vector<8x32xf32>
    %121 = math.tanh %120 : vector<8x32xf32>
    %122 = arith.mulf %115, %121 : vector<8x32xf32>
    %123 = vector.extract_strided_slice %9 {offsets = [24, 0], sizes = [8, 128], strides = [1, 1]} : vector<64x128xf32> to vector<8x128xf32>
    %124 = arith.addf %123, %105 : vector<8x128xf32>
    %125 = arith.negf %124 : vector<8x128xf32>
    %126 = math.exp %125 : vector<8x128xf32>
    %cst_20 = arith.constant 1.000000e+00 : f32
    %127 = vector.broadcast %cst_20 : f32 to vector<8x128xf32>
    %128 = arith.addf %127, %126 : vector<8x128xf32>
    %129 = arith.divf %127, %128 : vector<8x128xf32>
    %130 = vector.extract_strided_slice %129 {offsets = [0, 0], sizes = [8, 32], strides = [1, 1]} : vector<8x128xf32> to vector<8x32xf32>
    %131 = vector.extract_strided_slice %129 {offsets = [0, 32], sizes = [8, 32], strides = [1, 1]} : vector<8x128xf32> to vector<8x32xf32>
    %132 = vector.extract_strided_slice %129 {offsets = [0, 96], sizes = [8, 32], strides = [1, 1]} : vector<8x128xf32> to vector<8x32xf32>
    %133 = vector.extract_strided_slice %124 {offsets = [0, 64], sizes = [8, 32], strides = [1, 1]} : vector<8x128xf32> to vector<8x32xf32>
    %134 = math.tanh %133 : vector<8x32xf32>
    %135 = arith.mulf %131, %100 : vector<8x32xf32>
    %136 = arith.mulf %130, %134 : vector<8x32xf32>
    %137 = arith.addf %135, %136 : vector<8x32xf32>
    %138 = math.tanh %137 : vector<8x32xf32>
    %139 = arith.mulf %132, %138 : vector<8x32xf32>
    %140 = tpu.concatenate %139, %122 in 1 : vector<8x32xf32>, vector<8x32xf32> -> vector<8x64xf32>
    %cst_21 = arith.constant dense<0.000000e+00> : vector<8x256xf32>
    %141 = tpu.matmul %140, %0, %cst_21 {dimension_numbers = #tpu.dot_dimension_numbers<[1], [0], [0], [1], [0, 0, 1, 1], [], []>} : vector<8x64xf32>, vector<64x256xf32>, vector<8x256xf32> -> vector<8x256xf32>
    %142 = vector.extract_strided_slice %141 {offsets = [0, 0], sizes = [8, 128], strides = [1, 1]} : vector<8x256xf32> to vector<8x128xf32>
    %143 = vector.extract_strided_slice %141 {offsets = [0, 128], sizes = [8, 128], strides = [1, 1]} : vector<8x256xf32> to vector<8x128xf32>
    %144 = arith.addf %143, %3 : vector<8x128xf32>
    %145 = arith.negf %144 : vector<8x128xf32>
    %146 = math.exp %145 : vector<8x128xf32>
    %cst_22 = arith.constant 1.000000e+00 : f32
    %147 = vector.broadcast %cst_22 : f32 to vector<8x128xf32>
    %148 = arith.addf %147, %146 : vector<8x128xf32>
    %149 = arith.divf %147, %148 : vector<8x128xf32>
    %150 = vector.extract_strided_slice %149 {offsets = [0, 0], sizes = [8, 32], strides = [1, 1]} : vector<8x128xf32> to vector<8x32xf32>
    %151 = vector.extract_strided_slice %149 {offsets = [0, 32], sizes = [8, 32], strides = [1, 1]} : vector<8x128xf32> to vector<8x32xf32>
    %152 = vector.extract_strided_slice %149 {offsets = [0, 96], sizes = [8, 32], strides = [1, 1]} : vector<8x128xf32> to vector<8x32xf32>
    %153 = vector.extract_strided_slice %144 {offsets = [0, 64], sizes = [8, 32], strides = [1, 1]} : vector<8x128xf32> to vector<8x32xf32>
    %154 = math.tanh %153 : vector<8x32xf32>
    %155 = arith.mulf %151, %120 : vector<8x32xf32>
    %156 = arith.mulf %150, %154 : vector<8x32xf32>
    %157 = arith.addf %155, %156 : vector<8x32xf32>
    %158 = math.tanh %157 : vector<8x32xf32>
    %159 = arith.mulf %152, %158 : vector<8x32xf32>
    %160 = vector.extract_strided_slice %9 {offsets = [32, 0], sizes = [8, 128], strides = [1, 1]} : vector<64x128xf32> to vector<8x128xf32>
    %161 = arith.addf %160, %142 : vector<8x128xf32>
    %162 = arith.negf %161 : vector<8x128xf32>
    %163 = math.exp %162 : vector<8x128xf32>
    %cst_23 = arith.constant 1.000000e+00 : f32
    %164 = vector.broadcast %cst_23 : f32 to vector<8x128xf32>
    %165 = arith.addf %164, %163 : vector<8x128xf32>
    %166 = arith.divf %164, %165 : vector<8x128xf32>
    %167 = vector.extract_strided_slice %166 {offsets = [0, 0], sizes = [8, 32], strides = [1, 1]} : vector<8x128xf32> to vector<8x32xf32>
    %168 = vector.extract_strided_slice %166 {offsets = [0, 32], sizes = [8, 32], strides = [1, 1]} : vector<8x128xf32> to vector<8x32xf32>
    %169 = vector.extract_strided_slice %166 {offsets = [0, 96], sizes = [8, 32], strides = [1, 1]} : vector<8x128xf32> to vector<8x32xf32>
    %170 = vector.extract_strided_slice %161 {offsets = [0, 64], sizes = [8, 32], strides = [1, 1]} : vector<8x128xf32> to vector<8x32xf32>
    %171 = math.tanh %170 : vector<8x32xf32>
    %172 = arith.mulf %168, %137 : vector<8x32xf32>
    %173 = arith.mulf %167, %171 : vector<8x32xf32>
    %174 = arith.addf %172, %173 : vector<8x32xf32>
    %175 = math.tanh %174 : vector<8x32xf32>
    %176 = arith.mulf %169, %175 : vector<8x32xf32>
    %177 = tpu.concatenate %176, %159 in 1 : vector<8x32xf32>, vector<8x32xf32> -> vector<8x64xf32>
    %cst_24 = arith.constant dense<0.000000e+00> : vector<8x256xf32>
    %178 = tpu.matmul %177, %0, %cst_24 {dimension_numbers = #tpu.dot_dimension_numbers<[1], [0], [0], [1], [0, 0, 1, 1], [], []>} : vector<8x64xf32>, vector<64x256xf32>, vector<8x256xf32> -> vector<8x256xf32>
    %179 = vector.extract_strided_slice %178 {offsets = [0, 0], sizes = [8, 128], strides = [1, 1]} : vector<8x256xf32> to vector<8x128xf32>
    %180 = vector.extract_strided_slice %178 {offsets = [0, 128], sizes = [8, 128], strides = [1, 1]} : vector<8x256xf32> to vector<8x128xf32>
    %181 = arith.addf %180, %3 : vector<8x128xf32>
    %182 = arith.negf %181 : vector<8x128xf32>
    %183 = math.exp %182 : vector<8x128xf32>
    %cst_25 = arith.constant 1.000000e+00 : f32
    %184 = vector.broadcast %cst_25 : f32 to vector<8x128xf32>
    %185 = arith.addf %184, %183 : vector<8x128xf32>
    %186 = arith.divf %184, %185 : vector<8x128xf32>
    %187 = vector.extract_strided_slice %186 {offsets = [0, 0], sizes = [8, 32], strides = [1, 1]} : vector<8x128xf32> to vector<8x32xf32>
    %188 = vector.extract_strided_slice %186 {offsets = [0, 32], sizes = [8, 32], strides = [1, 1]} : vector<8x128xf32> to vector<8x32xf32>
    %189 = vector.extract_strided_slice %186 {offsets = [0, 96], sizes = [8, 32], strides = [1, 1]} : vector<8x128xf32> to vector<8x32xf32>
    %190 = vector.extract_strided_slice %181 {offsets = [0, 64], sizes = [8, 32], strides = [1, 1]} : vector<8x128xf32> to vector<8x32xf32>
    %191 = math.tanh %190 : vector<8x32xf32>
    %192 = arith.mulf %188, %157 : vector<8x32xf32>
    %193 = arith.mulf %187, %191 : vector<8x32xf32>
    %194 = arith.addf %192, %193 : vector<8x32xf32>
    %195 = math.tanh %194 : vector<8x32xf32>
    %196 = arith.mulf %189, %195 : vector<8x32xf32>
    %197 = vector.extract_strided_slice %9 {offsets = [40, 0], sizes = [8, 128], strides = [1, 1]} : vector<64x128xf32> to vector<8x128xf32>
    %198 = arith.addf %197, %179 : vector<8x128xf32>
    %199 = arith.negf %198 : vector<8x128xf32>
    %200 = math.exp %199 : vector<8x128xf32>
    %cst_26 = arith.constant 1.000000e+00 : f32
    %201 = vector.broadcast %cst_26 : f32 to vector<8x128xf32>
    %202 = arith.addf %201, %200 : vector<8x128xf32>
    %203 = arith.divf %201, %202 : vector<8x128xf32>
    %204 = vector.extract_strided_slice %203 {offsets = [0, 0], sizes = [8, 32], strides = [1, 1]} : vector<8x128xf32> to vector<8x32xf32>
    %205 = vector.extract_strided_slice %203 {offsets = [0, 32], sizes = [8, 32], strides = [1, 1]} : vector<8x128xf32> to vector<8x32xf32>
    %206 = vector.extract_strided_slice %203 {offsets = [0, 96], sizes = [8, 32], strides = [1, 1]} : vector<8x128xf32> to vector<8x32xf32>
    %207 = vector.extract_strided_slice %198 {offsets = [0, 64], sizes = [8, 32], strides = [1, 1]} : vector<8x128xf32> to vector<8x32xf32>
    %208 = math.tanh %207 : vector<8x32xf32>
    %209 = arith.mulf %205, %174 : vector<8x32xf32>
    %210 = arith.mulf %204, %208 : vector<8x32xf32>
    %211 = arith.addf %209, %210 : vector<8x32xf32>
    %212 = math.tanh %211 : vector<8x32xf32>
    %213 = arith.mulf %206, %212 : vector<8x32xf32>
    %214 = tpu.concatenate %213, %196 in 1 : vector<8x32xf32>, vector<8x32xf32> -> vector<8x64xf32>
    %cst_27 = arith.constant dense<0.000000e+00> : vector<8x256xf32>
    %215 = tpu.matmul %214, %0, %cst_27 {dimension_numbers = #tpu.dot_dimension_numbers<[1], [0], [0], [1], [0, 0, 1, 1], [], []>} : vector<8x64xf32>, vector<64x256xf32>, vector<8x256xf32> -> vector<8x256xf32>
    %216 = vector.extract_strided_slice %215 {offsets = [0, 0], sizes = [8, 128], strides = [1, 1]} : vector<8x256xf32> to vector<8x128xf32>
    %217 = vector.extract_strided_slice %215 {offsets = [0, 128], sizes = [8, 128], strides = [1, 1]} : vector<8x256xf32> to vector<8x128xf32>
    %218 = arith.addf %217, %3 : vector<8x128xf32>
    %219 = arith.negf %218 : vector<8x128xf32>
    %220 = math.exp %219 : vector<8x128xf32>
    %cst_28 = arith.constant 1.000000e+00 : f32
    %221 = vector.broadcast %cst_28 : f32 to vector<8x128xf32>
    %222 = arith.addf %221, %220 : vector<8x128xf32>
    %223 = arith.divf %221, %222 : vector<8x128xf32>
    %224 = vector.extract_strided_slice %223 {offsets = [0, 0], sizes = [8, 32], strides = [1, 1]} : vector<8x128xf32> to vector<8x32xf32>
    %225 = vector.extract_strided_slice %223 {offsets = [0, 32], sizes = [8, 32], strides = [1, 1]} : vector<8x128xf32> to vector<8x32xf32>
    %226 = vector.extract_strided_slice %223 {offsets = [0, 96], sizes = [8, 32], strides = [1, 1]} : vector<8x128xf32> to vector<8x32xf32>
    %227 = vector.extract_strided_slice %218 {offsets = [0, 64], sizes = [8, 32], strides = [1, 1]} : vector<8x128xf32> to vector<8x32xf32>
    %228 = math.tanh %227 : vector<8x32xf32>
    %229 = arith.mulf %225, %194 : vector<8x32xf32>
    %230 = arith.mulf %224, %228 : vector<8x32xf32>
    %231 = arith.addf %229, %230 : vector<8x32xf32>
    %232 = math.tanh %231 : vector<8x32xf32>
    %233 = arith.mulf %226, %232 : vector<8x32xf32>
    %234 = vector.extract_strided_slice %9 {offsets = [48, 0], sizes = [8, 128], strides = [1, 1]} : vector<64x128xf32> to vector<8x128xf32>
    %235 = arith.addf %234, %216 : vector<8x128xf32>
    %236 = arith.negf %235 : vector<8x128xf32>
    %237 = math.exp %236 : vector<8x128xf32>
    %cst_29 = arith.constant 1.000000e+00 : f32
    %238 = vector.broadcast %cst_29 : f32 to vector<8x128xf32>
    %239 = arith.addf %238, %237 : vector<8x128xf32>
    %240 = arith.divf %238, %239 : vector<8x128xf32>
    %241 = vector.extract_strided_slice %240 {offsets = [0, 0], sizes = [8, 32], strides = [1, 1]} : vector<8x128xf32> to vector<8x32xf32>
    %242 = vector.extract_strided_slice %240 {offsets = [0, 32], sizes = [8, 32], strides = [1, 1]} : vector<8x128xf32> to vector<8x32xf32>
    %243 = vector.extract_strided_slice %240 {offsets = [0, 96], sizes = [8, 32], strides = [1, 1]} : vector<8x128xf32> to vector<8x32xf32>
    %244 = vector.extract_strided_slice %235 {offsets = [0, 64], sizes = [8, 32], strides = [1, 1]} : vector<8x128xf32> to vector<8x32xf32>
    %245 = math.tanh %244 : vector<8x32xf32>
    %246 = arith.mulf %242, %211 : vector<8x32xf32>
    %247 = arith.mulf %241, %245 : vector<8x32xf32>
    %248 = arith.addf %246, %247 : vector<8x32xf32>
    %249 = math.tanh %248 : vector<8x32xf32>
    %250 = arith.mulf %243, %249 : vector<8x32xf32>
    %251 = tpu.concatenate %250, %233 in 1 : vector<8x32xf32>, vector<8x32xf32> -> vector<8x64xf32>
    %cst_30 = arith.constant dense<0.000000e+00> : vector<8x256xf32>
    %252 = tpu.matmul %251, %0, %cst_30 {dimension_numbers = #tpu.dot_dimension_numbers<[1], [0], [0], [1], [0, 0, 1, 1], [], []>} : vector<8x64xf32>, vector<64x256xf32>, vector<8x256xf32> -> vector<8x256xf32>
    %253 = vector.extract_strided_slice %252 {offsets = [0, 0], sizes = [8, 128], strides = [1, 1]} : vector<8x256xf32> to vector<8x128xf32>
    %254 = vector.extract_strided_slice %252 {offsets = [0, 128], sizes = [8, 128], strides = [1, 1]} : vector<8x256xf32> to vector<8x128xf32>
    %255 = arith.addf %254, %3 : vector<8x128xf32>
    %256 = arith.negf %255 : vector<8x128xf32>
    %257 = math.exp %256 : vector<8x128xf32>
    %cst_31 = arith.constant 1.000000e+00 : f32
    %258 = vector.broadcast %cst_31 : f32 to vector<8x128xf32>
    %259 = arith.addf %258, %257 : vector<8x128xf32>
    %260 = arith.divf %258, %259 : vector<8x128xf32>
    %261 = vector.extract_strided_slice %260 {offsets = [0, 0], sizes = [8, 32], strides = [1, 1]} : vector<8x128xf32> to vector<8x32xf32>
    %262 = vector.extract_strided_slice %260 {offsets = [0, 32], sizes = [8, 32], strides = [1, 1]} : vector<8x128xf32> to vector<8x32xf32>
    %263 = vector.extract_strided_slice %260 {offsets = [0, 96], sizes = [8, 32], strides = [1, 1]} : vector<8x128xf32> to vector<8x32xf32>
    %264 = vector.extract_strided_slice %255 {offsets = [0, 64], sizes = [8, 32], strides = [1, 1]} : vector<8x128xf32> to vector<8x32xf32>
    %265 = math.tanh %264 : vector<8x32xf32>
    %266 = arith.mulf %262, %231 : vector<8x32xf32>
    %267 = arith.mulf %261, %265 : vector<8x32xf32>
    %268 = arith.addf %266, %267 : vector<8x32xf32>
    %269 = math.tanh %268 : vector<8x32xf32>
    %270 = arith.mulf %263, %269 : vector<8x32xf32>
    %271 = vector.extract_strided_slice %9 {offsets = [56, 0], sizes = [8, 128], strides = [1, 1]} : vector<64x128xf32> to vector<8x128xf32>
    %272 = arith.addf %271, %253 : vector<8x128xf32>
    %273 = arith.negf %272 : vector<8x128xf32>
    %274 = math.exp %273 : vector<8x128xf32>
    %cst_32 = arith.constant 1.000000e+00 : f32
    %275 = vector.broadcast %cst_32 : f32 to vector<8x128xf32>
    %276 = arith.addf %275, %274 : vector<8x128xf32>
    %277 = arith.divf %275, %276 : vector<8x128xf32>
    %278 = vector.extract_strided_slice %277 {offsets = [0, 0], sizes = [8, 32], strides = [1, 1]} : vector<8x128xf32> to vector<8x32xf32>
    %279 = vector.extract_strided_slice %277 {offsets = [0, 32], sizes = [8, 32], strides = [1, 1]} : vector<8x128xf32> to vector<8x32xf32>
    %280 = vector.extract_strided_slice %277 {offsets = [0, 96], sizes = [8, 32], strides = [1, 1]} : vector<8x128xf32> to vector<8x32xf32>
    %281 = vector.extract_strided_slice %272 {offsets = [0, 64], sizes = [8, 32], strides = [1, 1]} : vector<8x128xf32> to vector<8x32xf32>
    %282 = math.tanh %281 : vector<8x32xf32>
    %283 = arith.mulf %279, %248 : vector<8x32xf32>
    %284 = arith.mulf %278, %282 : vector<8x32xf32>
    %285 = arith.addf %283, %284 : vector<8x32xf32>
    %286 = math.tanh %285 : vector<8x32xf32>
    %287 = arith.mulf %280, %286 : vector<8x32xf32>
    %288 = tpu.concatenate %287, %270 in 1 : vector<8x32xf32>, vector<8x32xf32> -> vector<8x64xf32>
    %cst_33 = arith.constant dense<0.000000e+00> : vector<8x256xf32>
    %289 = tpu.matmul %288, %0, %cst_33 {dimension_numbers = #tpu.dot_dimension_numbers<[1], [0], [0], [1], [0, 0, 1, 1], [], []>} : vector<8x64xf32>, vector<64x256xf32>, vector<8x256xf32> -> vector<8x256xf32>
    %290 = vector.extract_strided_slice %289 {offsets = [0, 128], sizes = [8, 128], strides = [1, 1]} : vector<8x256xf32> to vector<8x128xf32>
    %291 = arith.addf %290, %3 : vector<8x128xf32>
    %292 = arith.negf %291 : vector<8x128xf32>
    %293 = math.exp %292 : vector<8x128xf32>
    %cst_34 = arith.constant 1.000000e+00 : f32
    %294 = vector.broadcast %cst_34 : f32 to vector<8x128xf32>
    %295 = arith.addf %294, %293 : vector<8x128xf32>
    %296 = arith.divf %294, %295 : vector<8x128xf32>
    %297 = vector.extract_strided_slice %296 {offsets = [0, 0], sizes = [8, 32], strides = [1, 1]} : vector<8x128xf32> to vector<8x32xf32>
    %298 = vector.extract_strided_slice %296 {offsets = [0, 32], sizes = [8, 32], strides = [1, 1]} : vector<8x128xf32> to vector<8x32xf32>
    %299 = vector.extract_strided_slice %296 {offsets = [0, 96], sizes = [8, 32], strides = [1, 1]} : vector<8x128xf32> to vector<8x32xf32>
    %300 = vector.extract_strided_slice %291 {offsets = [0, 64], sizes = [8, 32], strides = [1, 1]} : vector<8x128xf32> to vector<8x32xf32>
    %301 = math.tanh %300 : vector<8x32xf32>
    %302 = arith.mulf %298, %268 : vector<8x32xf32>
    %303 = arith.mulf %297, %301 : vector<8x32xf32>
    %304 = arith.addf %302, %303 : vector<8x32xf32>
    %305 = math.tanh %304 : vector<8x32xf32>
    %306 = arith.mulf %299, %305 : vector<8x32xf32>
    %c0_35 = arith.constant 0 : index
    %c0_36 = arith.constant 0 : index
    %307 = vector.load %arg5[%c0_35, %c0_36] : memref<32x1xf32, #tpu.memory_space<vmem>>, vector<32x1xf32>
    %cst_37 = arith.constant dense<0.000000e+00> : vector<8x1xf32>
    %308 = tpu.matmul %306, %307, %cst_37 {dimension_numbers = #tpu.dot_dimension_numbers<[1], [0], [0], [1], [0, 0, 1, 1], [], []>} : vector<8x32xf32>, vector<32x1xf32>, vector<8x1xf32> -> vector<8x1xf32>
    %c0_38 = arith.constant 0 : index
    %c0_39 = arith.constant 0 : index
    %309 = vector.load %arg6[%c0_38, %c0_39] : memref<1x1xf32, #tpu.memory_space<vmem>>, vector<1x1xf32>
    %310 = vector.broadcast %309 : vector<1x1xf32> to vector<8x1xf32>
    %311 = arith.addf %308, %310 : vector<8x1xf32>
    %c0_40 = arith.constant 0 : index
    %c0_41 = arith.constant 0 : index
    %312 = vector.load %arg7[%c0_40, %c0_41] : memref<8x1xf32, #tpu.memory_space<vmem>>, vector<8x1xf32>
    tpu.vector_store %arg7[%c0_40, %c0_41], %311 {strides = array<i32>} : memref<8x1xf32, #tpu.memory_space<vmem>>, vector<8x1xf32>,
    return
  }
}

</mosaic_0001>

<bundles_post_ra>
// kernel: tpu_custom_call.1
= control target key start
LH: loop header
LB: loop body
LE: loop exit
PB: predicated region body
PF: predicated region fallthrough
CT: control target
= control target key end

     0   :  { %s2078_s0 = inlined_call_operand.vmem [shape: f32[64,4], index: 0, kind: input, shape index: {}]   ;;  %s2079_s1 = inlined_call_operand.vmem [shape: f32[4,128], index: 1, kind: input, shape index: {}]   ;;  %s2080_s2 = inlined_call_operand.vmem [shape: f32[1,128], index: 2, kind: input, shape index: {}]   ;;  %s2081_s3 = inlined_call_operand.hbm [shape: f32[64,256], index: 3, kind: input, shape index: {}]   ;;  %s2082_s4 = inlined_call_operand.vmem [shape: f32[1,128], index: 4, kind: input, shape index: {}]   ;;  %s2083_s5 = inlined_call_operand.vmem [shape: f32[32,1], index: 5, kind: input, shape index: {}]   ;;  %s2084_s6 = inlined_call_operand.<no memory space> [shape: f32[1,1], index: 6, kind: input, shape index: {}]   ;;  %s2085_s7 = inlined_call_operand.vmem [shape: f32[8,1], index: 7, kind: output, shape index: {}]  }
   0x1   :  { %v12_v0 = vstv %s2084_s6 }
   0x2   :  { %13 = vst [vmem:[#allocation2] sm:$0x1] %v12_v0 }
   0x3   :  { %14 = vsyncpa [#allocation4], 0  ;;  %s1739_s26 = smov [#allocation3]   ;;  %s1715_s30 = scalar_lea.hbm %s2081_s3, 2048 }
   0x4   :  { %s26_s27 = sshll.u32 %s1739_s26, 4  ;;  %p1716_p0 = scmp.ne.s32.totalorder %s2081_s3, %s1715_s30  ;;  %s27_s27 = int_to_ptr.vmem [resolvable:$true] %s26_s27 }
   0x5   :  { %p1719_p1 = scmp.lt.u32.totalorder %s1715_s30, %s2081_s3 }
   0x7   :  { %p1721_p2 = pnand %p1719_p1, %p1716_p0 }
   0x9   :  { %1724 = shalt.err (!%p1721_p2)
}
   0xa   :  { %s1725_s6 = scalar_lea.vmem %s27_s27, 2048  ;;  %p1730_p4 = scmp.lt.s32.totalorder %s27_s27, %s27_s27 }
   0xb   :  { %p1726_p3 = scmp.ne.s32.totalorder %s27_s27, %s1725_s6  ;;  %p1731_p5 = scmp.lt.s32.totalorder %s1725_s6, %s1725_s6 }
   0xd   :  { %p1732_p6 = por %p1731_p5, %p1730_p4 }
   0xf   :  { %p1733_p7 = pnand %p1732_p6, %p1726_p3 }
  0x11   :  { %1736 = shalt.err (!%p1733_p7)
}
  0x12   :  { %s1740_s12 = smov 256   ;;  %s1741_s13 = smov 16  }
  0x13   :  { %32 = dma.hbm_to_vmem [thread:$0]  %s2081_s3, 2048, %s27_s27, [#allocation4], %s1740_s12, %s1740_s12, %s1741_s13  }
  0x14   :  { %1737 = dma.done.wait [#allocation4], 2048  }
  0x15   :  { %1738 = vsyncadd [#allocation4], 4294965248  ;;  %vm106_vm0 = vcmask 1043456   ;;  %vm81_vm1 = vcmask 31744   ;;  %v73_v1 = vld [vmem:[%s2079_s1] sm:$0xf] }
  0x16   :  { %v65_v2 = vld [vmem:[%s2078_s0] sm:$0xff]  ;;  %v66_v3 = vld [vmem:[%s2078_s0 + $0x8] sm:$0xff]  ;;  %1420 = vmatprep.subr.msk.mxu0 %vm106_vm0, %v73_v1  ;;  %s1742_s1 = smov 64   ;;  %v44_v22 = vld [vmem:[#allocation3 + $0x10] sm:$0xff]  ;;  %v1744_v43 = vmov 0.0   ;;  %vm244_vm2 = vcmask 261120  }
  0x17   :  { %1422 = vmatprep.mubr.msk.f32.mxu0 %vm81_vm1, %v65_v2  ;;  %1421 = vmatpush3.msk.msra.mxu0 %vm106_vm0, %v73_v1  ;;  %v1816_v4 = vld [vmem:[%s2080_s2] ss:$0 sm:$0xff]  ;;  %s1743_s2 = smov 32   ;;  %v43_v18 = vld [vmem:[#allocation3 + $0x8] sm:$0xff]  ;;  %v42_v20 = vld [vmem:[#allocation3] sm:$0xff]  ;;  %vm246_vm3 = vcmask 523264  }
  0x18   :  { %1423 = vmatmul.mubr.msk.f32.vlgmr.msra.gmra.mrb[0].mxu0 %vm81_vm1, %v66_v3  ;;  %v45_v19 = vld [vmem:[#allocation3 + $0x18] sm:$0xff]  ;;  %v47_v23 = vld [vmem:[#allocation3 + $0x28] sm:$0xff]  ;;  %v1828_v25 = vpack.c.bf16 %v44_v22, %v42_v20  ;;  %v46_v27 = vld [vmem:[#allocation3 + $0x20] sm:$0xff]  ;;  %314 = vmatprep.mubr.f32.mxu1 %v1744_v43  ;;  %vm1746_vm4 = vmmov 0   ;;  %vm1362_vm5 = vcmask 7168  }
  0x19   :  { %v1826_v21 = vpack.c.bf16 %v45_v19, %v43_v18  ;;  %v49_v24 = vld [vmem:[#allocation3 + $0x38] sm:$0xff]  ;;  %v48_v28 = vld [vmem:[#allocation3 + $0x30] sm:$0xff]  ;;  %v51_v29 = vld [vmem:[#allocation3 + $0x48] sm:$0xff] }
  0x1a   :  { %v1830_v26 = vpack.c.bf16 %v49_v24, %v47_v23  ;;  %v53_v30 = vld [vmem:[#allocation3 + $0x58] sm:$0xff]  ;;  %v1835_v31 = vpack.c.bf16 %v48_v28, %v46_v27  ;;  %v50_v33 = vld [vmem:[#allocation3 + $0x40] sm:$0xff]  ;;  %v52_v34 = vld [vmem:[#allocation3 + $0x50] sm:$0xff] }
  0x1b   :  { %1446 = vmatprep.subr.bf16.mxu1 %v1826_v21  ;;  %1462 = vmatprep.subr.bf16.mxu0 %v1826_v21  ;;  %v1839_v32 = vpack.c.bf16 %v53_v30, %v51_v29  ;;  %v55_v35 = vld [vmem:[#allocation3 + $0x68] sm:$0xff]  ;;  %v57_v36 = vld [vmem:[#allocation3 + $0x78] sm:$0xff]  ;;  %v1843_v37 = vpack.c.bf16 %v52_v34, %v50_v33  ;;  %v54_v39 = vld [vmem:[#allocation3 + $0x60] sm:$0xff] }
  0x1c   :  { %1448 = vmatpush1.bf16.msra.mxu1 %v1828_v25  ;;  %1464 = vmatpush1.bf16.msra.mxu0 %v1828_v25  ;;  %v1847_v38 = vpack.c.bf16 %v57_v36, %v55_v35  ;;  %v56_v40 = vld [vmem:[#allocation3 + $0x70] sm:$0xff]  ;;  %v1879_v49 = vld [vmem:[%s2082_s4] ss:$0 sm:$0xff] }
  0x1d   :  { %1450 = vmatprep.subr.bf16.mxu1 %v1830_v26  ;;  %1466 = vmatprep.subr.bf16.mxu0 %v1830_v26  ;;  %v1852_v42 = vpack.c.bf16 %v56_v40, %v54_v39 }
  0x20   :  { %1452 = vmatpush1.bf16.msra.mxu1 %v1835_v31  ;;  %1468 = vmatpush1.bf16.msra.mxu0 %v1835_v31 }
  0x21   :  { %1454 = vmatprep.subr.bf16.mxu1 %v1839_v32  ;;  %1470 = vmatprep.subr.bf16.mxu0 %v1839_v32 }
  0x24   :  { %1456 = vmatpush1.bf16.msra.mxu1 %v1843_v37  ;;  %1472 = vmatpush1.bf16.msra.mxu0 %v1843_v37 }
  0x25   :  { %1458 = vmatprep.subr.bf16.mxu1 %v1847_v38  ;;  %1474 = vmatprep.subr.bf16.mxu0 %v1847_v38 }
  0x28   :  { %1460 = vmatpush1.bf16.msra.mxu1 %v1852_v42  ;;  %1476 = vmatpush1.bf16.msra.mxu0 %v1852_v42 }
  0x29   :  { %1478 = vmatprep.subr.bf16.mxu1 %v1826_v21  ;;  %1494 = vmatprep.subr.bf16.mxu0 %v1826_v21 }
  0xeb   :  { %v1818_v5 = vpop.f32.mrb[0].mxu0 }
  0xec   :  { %v176_v6 = vpop.f32.mrb[1].mxu0  ;;  %v182_v48 = vadd.f32 %v1818_v5, %v1816_v4 }
  0xed   :  { %v177_v7 = vadd.f32 %v1816_v4, %v176_v6 }
  0xef   :  { %1587 = vtanh.f32 %v177_v7  ;;  %v1380_v9 = vmul.f32 -1.442695, %v177_v7 }
  0xf1   :  { %1589 = vpow2.f32 %v1380_v9 }
  0xf9   :  { %v1588_v8 = vpop.eup %1587 }
  0xfa   :  { %225 = vrot.lane.b32.xlu0 %v1588_v8, %s1742_s1 }
  0xfb   :  { %v1590_v10 = vpop.eup %1589 }
  0xfc   :  { %v219_v11 = vadd.f32 1.0, %v1590_v10 }
  0xfe   :  { %1591 = vrcp.f32 %v219_v11  ;;  %v67_v11 = vld [vmem:[%s2078_s0 + $0x10] sm:$0xff] }
  0xff   :  { %1425 = vmatprep.mubr.msk.f32.mxu0 %vm81_vm1, %v67_v11 }
 0x108   :  { %v1592_v12 = vpop.eup %1591 }
 0x109   :  { %v223_v15 = vmul.f32 0.0, %v1592_v12 }
 0x16c   :  { %v226_v13 = vpop.permute.xlu0 %225 }
 0x16d   :  { %v228_v14 = vmul.f32 %v1592_v12, %v226_v13  ;;  %v69_v13 = vld [vmem:[%s2078_s0 + $0x20] sm:$0xff] }
 0x16f   :  { %230 = vrot.lane.b32.xlu0 %v228_v14, %s1743_s2  ;;  %v70_v14 = vld [vmem:[%s2078_s0 + $0x28] sm:$0xff] }
 0x1e1   :  { %v231_v16 = vpop.permute.xlu0 %230 }
 0x1e2   :  { %v1823_v17 = vadd.f32 %v231_v16, %v223_v15  ;;  %v71_v15 = vld [vmem:[%s2078_s0 + $0x30] sm:$0xff]  ;;  %v72_v16 = vld [vmem:[%s2078_s0 + $0x38] sm:$0xff] }
 0x1e4   :  { %1593 = vtanh.f32 %v1823_v17 }
 0x1ee   :  { %v1594_v41 = vpop.eup %1593 }
 0x1ef   :  { %236 = vrot.lane.b32.xlu1 %v1594_v41, %s1742_s1 }
 0x261   :  { %v237_v44 = vpop.permute.xlu1 %236 }
 0x262   :  { %v239_v45 = vmul.f32 %v1592_v12, %v237_v44  ;;  %v68_v12 = vld [vmem:[%s2078_s0 + $0x18] sm:$0xff] }
 0x263   :  { %1426 = vmatmul.mubr.msk.f32.gmra.mrb[2].mxu0 %vm81_vm1, %v68_v12 }
 0x264   :  { %241 = vrot.lane.b32.xlu1 %v239_v45, %s1743_s2  ;;  %1428 = vmatprep.mubr.msk.f32.mxu0 %vm81_vm1, %v69_v13 }
 0x267   :  { %1429 = vmatmul.mubr.msk.f32.gmra.mrb[4].mxu0 %vm81_vm1, %v70_v14 }
 0x268   :  { %1431 = vmatprep.mubr.msk.f32.mxu0 %vm81_vm1, %v71_v15 }
 0x26b   :  { %1432 = vmatmul.mubr.msk.f32.gmra.mrb[6].mxu0 %vm81_vm1, %v72_v16 }
 0x26c   :  { %447 = vmatprep.mubr.f32.mxu0 %v1744_v43 }
 0x2d6   :  { %v242_v46 = vpop.permute.xlu1 %241 }
 0x2d7   :  { %v245_v47 = vsel %vm244_vm2, %v242_v46, 0.0 }
 0x2d8   :  { %1381 = vmatmul.mubr.msk.f32.vlgmr.msra.gmra.mrb[0].mxu1 %vm246_vm3, %v245_v47 }
 0x2d9   :  { %1480 = vmatpush1.bf16.msra.mxu1 %v1828_v25  ;;  %580 = vmatprep.mubr.f32.mxu1 %v1744_v43 }
 0x2da   :  { %1482 = vmatprep.subr.bf16.mxu1 %v1830_v26 }
 0x2dd   :  { %1484 = vmatpush1.bf16.msra.mxu1 %v1835_v31 }
 0x2de   :  { %1486 = vmatprep.subr.bf16.mxu1 %v1839_v32 }
 0x2e1   :  { %1488 = vmatpush1.bf16.msra.mxu1 %v1843_v37 }
 0x2e2   :  { %1490 = vmatprep.subr.bf16.mxu1 %v1847_v38 }
 0x2e5   :  { %1492 = vmatpush1.bf16.msra.mxu1 %v1852_v42 }
 0x2e6   :  { %1510 = vmatprep.subr.bf16.mxu1 %v1826_v21 }
 0x336   :  { %v1922_v24 = vpop.f32.mrb[2].mxu0 }
 0x337   :  { %v186_v27 = vpop.f32.mrb[3].mxu0  ;;  %v192_v13 = vadd.f32 %v1922_v24, %v1816_v4 }
 0x338   :  { %v187_v39 = vadd.f32 %v1816_v4, %v186_v27 }
 0x33a   :  { %v1924_v28 = vpop.f32.mrb[4].mxu0 }
 0x33b   :  { %v1926_v29 = vpop.f32.mrb[5].mxu0 }
 0x33e   :  { %v1928_v30 = vpop.f32.mrb[6].mxu0 }
 0x33f   :  { %v1930_v33 = vpop.f32.mrb[7].mxu0 }
 0x3ab   :  { %v316_v50 = vpop.f32.mrb[0].mxu1 }
 0x3ac   :  { %v346_v51 = vadd.f32 %v316_v50, %v182_v48  ;;  %v318_v52 = vpop.f32.mrb[1].mxu1 }
 0x3ad   :  { %v321_v53 = vadd.f32 %v1879_v49, %v318_v52 }
 0x3ae   :  { %1595 = vtanh.f32 %v346_v51  ;;  %v1383_v56 = vmul.f32 -1.442695, %v346_v51 }
 0x3af   :  { %1597 = vtanh.f32 %v321_v53  ;;  %v1382_v57 = vmul.f32 -1.442695, %v321_v53 }
 0x3b0   :  { %1599 = vpow2.f32 %v1383_v56 }
 0x3b1   :  { %1601 = vpow2.f32 %v1382_v57 }
 0x3b8   :  { %v1596_v54 = vpop.eup %1595 }
 0x3b9   :  { %v1598_v55 = vpop.eup %1597  ;;  %356 = vrot.lane.b32.xlu1 %v1596_v54, %s1742_s1 }
 0x3ba   :  { %331 = vrot.lane.b32.xlu0 %v1598_v55, %s1742_s1  ;;  %v1600_v58 = vpop.eup %1599 }
 0x3bb   :  { %v1602_v59 = vpop.eup %1601  ;;  %v350_v60 = vadd.f32 1.0, %v1600_v58 }
 0x3bc   :  { %v325_v61 = vadd.f32 1.0, %v1602_v59 }
 0x3bd   :  { %1603 = vrcp.f32 %v350_v60 }
 0x3be   :  { %1605 = vrcp.f32 %v325_v61 }
 0x3c7   :  { %v1604_v62 = vpop.eup %1603 }
 0x3c8   :  { %v1606_v0 = vpop.eup %1605  ;;  %v354_v5 = vmul.f32 %v1604_v62, %v1823_v17 }
 0x3c9   :  { %v329_v7 = vmul.f32 0.0, %v1606_v0 }
 0x42b   :  { %v357_v63 = vpop.permute.xlu1 %356 }
 0x42c   :  { %v359_v1 = vmul.f32 %v1604_v62, %v357_v63  ;;  %v332_v2 = vpop.permute.xlu0 %331 }
 0x42d   :  { %v334_v3 = vmul.f32 %v1606_v0, %v332_v2 }
 0x42e   :  { %361 = vrot.lane.b32.xlu1 %v359_v1, %s1743_s2 }
 0x42f   :  { %336 = vrot.lane.b32.xlu0 %v334_v3, %s1743_s2 }
 0x4a0   :  { %v362_v6 = vpop.permute.xlu1 %361 }
 0x4a1   :  { %v1887_v8 = vadd.f32 %v362_v6, %v354_v5  ;;  %v337_v9 = vpop.permute.xlu0 %336 }
 0x4a2   :  { %v1889_v10 = vadd.f32 %v337_v9, %v329_v7 }
 0x4a3   :  { %1607 = vtanh.f32 %v1887_v8 }
 0x4a4   :  { %1609 = vtanh.f32 %v1889_v10 }
 0x4ad   :  { %v1608_v17 = vpop.eup %1607 }
 0x4ae   :  { %v1610_v18 = vpop.eup %1609  ;;  %367 = vrot.lane.b32.xlu1 %v1608_v17, %s1742_s1 }
 0x4af   :  { %342 = vrot.lane.b32.xlu0 %v1610_v18, %s1742_s1 }
 0x520   :  { %v368_v19 = vpop.permute.xlu1 %367 }
 0x521   :  { %v370_v20 = vmul.f32 %v1604_v62, %v368_v19  ;;  %v343_v22 = vpop.permute.xlu0 %342 }
 0x522   :  { %v345_v23 = vmul.f32 %v1606_v0, %v343_v22 }
 0x523   :  { %372 = vrot.lane.b32.xlu0 %v370_v20, %s1743_s2 }
 0x524   :  { %376 = vrot.lane.b32.xlu1 %v345_v23, %s1742_s1 }
 0x595   :  { %v373_v34 = vpop.permute.xlu0 %372 }
 0x596   :  { %v377_v35 = vpop.permute.xlu1 %376 }
 0x597   :  { %v379_v36 = vsel %vm244_vm2, %v373_v34, %v377_v35 }
 0x598   :  { %1384 = vmatmul.mubr.msk.f32.vlgmr.msra.gmra.mrb[8].mxu0 %vm246_vm3, %v379_v36 }
 0x599   :  { %1496 = vmatpush1.bf16.msra.mxu0 %v1828_v25  ;;  %713 = vmatprep.mubr.f32.mxu0 %v1744_v43 }
 0x59a   :  { %1498 = vmatprep.subr.bf16.mxu0 %v1830_v26 }
 0x59d   :  { %1500 = vmatpush1.bf16.msra.mxu0 %v1835_v31 }
 0x59e   :  { %1502 = vmatprep.subr.bf16.mxu0 %v1839_v32 }
 0x5a1   :  { %1504 = vmatpush1.bf16.msra.mxu0 %v1843_v37 }
 0x5a2   :  { %1506 = vmatprep.subr.bf16.mxu0 %v1847_v38 }
 0x5a5   :  { %1508 = vmatpush1.bf16.msra.mxu0 %v1852_v42 }
 0x5a6   :  { %1526 = vmatprep.subr.bf16.mxu0 %v1826_v21 }
 0x66b   :  { %v449_v40 = vpop.f32.mrb[8].mxu0 }
 0x66c   :  { %v479_v41 = vadd.f32 %v449_v40, %v187_v39  ;;  %v451_v44 = vpop.f32.mrb[9].mxu0 }
 0x66d   :  { %v454_v45 = vadd.f32 %v1879_v49, %v451_v44 }
 0x66e   :  { %1611 = vtanh.f32 %v479_v41  ;;  %v1386_v48 = vmul.f32 -1.442695, %v479_v41 }
 0x66f   :  { %1613 = vtanh.f32 %v454_v45  ;;  %v1385_v50 = vmul.f32 -1.442695, %v454_v45 }
 0x670   :  { %1615 = vpow2.f32 %v1386_v48 }
 0x671   :  { %1617 = vpow2.f32 %v1385_v50 }
 0x678   :  { %v1612_v46 = vpop.eup %1611 }
 0x679   :  { %v1614_v47 = vpop.eup %1613  ;;  %489 = vrot.lane.b32.xlu1 %v1612_v46, %s1742_s1 }
 0x67a   :  { %464 = vrot.lane.b32.xlu0 %v1614_v47, %s1742_s1  ;;  %v1616_v51 = vpop.eup %1615 }
 0x67b   :  { %v1618_v52 = vpop.eup %1617  ;;  %v483_v53 = vadd.f32 1.0, %v1616_v51 }
 0x67c   :  { %v458_v54 = vadd.f32 1.0, %v1618_v52 }
 0x67d   :  { %1619 = vrcp.f32 %v483_v53 }
 0x67e   :  { %1621 = vrcp.f32 %v458_v54 }
 0x687   :  { %v1620_v55 = vpop.eup %1619 }
 0x688   :  { %v1622_v57 = vpop.eup %1621  ;;  %v487_v61 = vmul.f32 %v1620_v55, %v1887_v8 }
 0x689   :  { %v462_v63 = vmul.f32 %v1622_v57, %v1889_v10 }
 0x6eb   :  { %v490_v56 = vpop.permute.xlu1 %489 }
 0x6ec   :  { %v492_v58 = vmul.f32 %v1620_v55, %v490_v56  ;;  %v465_v59 = vpop.permute.xlu0 %464 }
 0x6ed   :  { %v467_v60 = vmul.f32 %v1622_v57, %v465_v59 }
 0x6ee   :  { %494 = vrot.lane.b32.xlu1 %v492_v58, %s1743_s2 }
 0x6ef   :  { %469 = vrot.lane.b32.xlu0 %v467_v60, %s1743_s2 }
 0x760   :  { %v495_v62 = vpop.permute.xlu1 %494 }
 0x761   :  { %v497_v0 = vadd.f32 %v495_v62, %v487_v61  ;;  %v470_v1 = vpop.permute.xlu0 %469  ;;  %v197_v61 = vadd.f32 %v1816_v4, %v1926_v29 }
 0x762   :  { %v472_v2 = vadd.f32 %v470_v1, %v462_v63 }
 0x763   :  { %1623 = vtanh.f32 %v497_v0 }
 0x764   :  { %1625 = vtanh.f32 %v472_v2 }
 0x76d   :  { %v1624_v3 = vpop.eup %1623 }
 0x76e   :  { %v1626_v5 = vpop.eup %1625  ;;  %500 = vrot.lane.b32.xlu1 %v1624_v3, %s1742_s1 }
 0x76f   :  { %475 = vrot.lane.b32.xlu0 %v1626_v5, %s1742_s1 }
 0x7e0   :  { %v501_v6 = vpop.permute.xlu1 %500 }
 0x7e1   :  { %v503_v7 = vmul.f32 %v1620_v55, %v501_v6  ;;  %v476_v9 = vpop.permute.xlu0 %475 }
 0x7e2   :  { %v478_v11 = vmul.f32 %v1622_v57, %v476_v9 }
 0x7e3   :  { %505 = vrot.lane.b32.xlu0 %v503_v7, %s1743_s2 }
 0x7e4   :  { %509 = vrot.lane.b32.xlu1 %v478_v11, %s1742_s1 }
 0x855   :  { %v506_v8 = vpop.permute.xlu0 %505 }
 0x856   :  { %v510_v10 = vpop.permute.xlu1 %509 }
 0x857   :  { %v512_v12 = vsel %vm244_vm2, %v506_v8, %v510_v10 }
 0x858   :  { %1387 = vmatmul.mubr.msk.f32.vlgmr.msra.gmra.mrb[2].mxu1 %vm246_vm3, %v512_v12 }
 0x859   :  { %1512 = vmatpush1.bf16.msra.mxu1 %v1828_v25  ;;  %846 = vmatprep.mubr.f32.mxu1 %v1744_v43 }
 0x85a   :  { %1514 = vmatprep.subr.bf16.mxu1 %v1830_v26 }
 0x85d   :  { %1516 = vmatpush1.bf16.msra.mxu1 %v1835_v31 }
 0x85e   :  { %1518 = vmatprep.subr.bf16.mxu1 %v1839_v32 }
 0x861   :  { %1520 = vmatpush1.bf16.msra.mxu1 %v1843_v37 }
 0x862   :  { %1522 = vmatprep.subr.bf16.mxu1 %v1847_v38 }
 0x865   :  { %1524 = vmatpush1.bf16.msra.mxu1 %v1852_v42 }
 0x866   :  { %1542 = vmatprep.subr.bf16.mxu1 %v1826_v21 }
 0x92b   :  { %v582_v14 = vpop.f32.mrb[2].mxu1 }
 0x92c   :  { %v612_v15 = vadd.f32 %v582_v14, %v192_v13  ;;  %v584_v16 = vpop.f32.mrb[3].mxu1 }
 0x92d   :  { %v587_v17 = vadd.f32 %v1879_v49, %v584_v16 }
 0x92e   :  { %1627 = vtanh.f32 %v612_v15  ;;  %v1389_v20 = vmul.f32 -1.442695, %v612_v15 }
 0x92f   :  { %1629 = vtanh.f32 %v587_v17  ;;  %v1388_v22 = vmul.f32 -1.442695, %v587_v17 }
 0x930   :  { %1631 = vpow2.f32 %v1389_v20 }
 0x931   :  { %1633 = vpow2.f32 %v1388_v22 }
 0x938   :  { %v1628_v18 = vpop.eup %1627 }
 0x939   :  { %v1630_v19 = vpop.eup %1629  ;;  %622 = vrot.lane.b32.xlu1 %v1628_v18, %s1742_s1 }
 0x93a   :  { %597 = vrot.lane.b32.xlu0 %v1630_v19, %s1742_s1  ;;  %v1632_v23 = vpop.eup %1631 }
 0x93b   :  { %v1634_v27 = vpop.eup %1633  ;;  %v616_v24 = vadd.f32 1.0, %v1632_v23 }
 0x93c   :  { %v591_v34 = vadd.f32 1.0, %v1634_v27 }
 0x93d   :  { %1635 = vrcp.f32 %v616_v24 }
 0x93e   :  { %1637 = vrcp.f32 %v591_v34 }
 0x947   :  { %v1636_v35 = vpop.eup %1635 }
 0x948   :  { %v1638_v39 = vpop.eup %1637  ;;  %v620_v45 = vmul.f32 %v1636_v35, %v497_v0 }
 0x949   :  { %v595_v47 = vmul.f32 %v1638_v39, %v472_v2 }
 0x9ab   :  { %v623_v36 = vpop.permute.xlu1 %622 }
 0x9ac   :  { %v625_v40 = vmul.f32 %v1636_v35, %v623_v36  ;;  %v598_v41 = vpop.permute.xlu0 %597 }
 0x9ad   :  { %v600_v44 = vmul.f32 %v1638_v39, %v598_v41  ;;  %v202_v41 = vadd.f32 %v1924_v28, %v1816_v4 }
 0x9ae   :  { %627 = vrot.lane.b32.xlu1 %v625_v40, %s1743_s2 }
 0x9af   :  { %602 = vrot.lane.b32.xlu0 %v600_v44, %s1743_s2 }
 0xa20   :  { %v628_v46 = vpop.permute.xlu1 %627 }
 0xa21   :  { %v630_v48 = vadd.f32 %v628_v46, %v620_v45  ;;  %v603_v50 = vpop.permute.xlu0 %602 }
 0xa22   :  { %v605_v51 = vadd.f32 %v603_v50, %v595_v47 }
 0xa23   :  { %1639 = vtanh.f32 %v630_v48 }
 0xa24   :  { %1641 = vtanh.f32 %v605_v51 }
 0xa2d   :  { %v1640_v52 = vpop.eup %1639 }
 0xa2e   :  { %v1642_v53 = vpop.eup %1641  ;;  %633 = vrot.lane.b32.xlu1 %v1640_v52, %s1742_s1 }
 0xa2f   :  { %608 = vrot.lane.b32.xlu0 %v1642_v53, %s1742_s1 }
 0xaa0   :  { %v634_v54 = vpop.permute.xlu1 %633 }
 0xaa1   :  { %v636_v55 = vmul.f32 %v1636_v35, %v634_v54  ;;  %v609_v56 = vpop.permute.xlu0 %608 }
 0xaa2   :  { %v611_v57 = vmul.f32 %v1638_v39, %v609_v56 }
 0xaa3   :  { %638 = vrot.lane.b32.xlu0 %v636_v55, %s1743_s2 }
 0xaa4   :  { %642 = vrot.lane.b32.xlu1 %v611_v57, %s1742_s1 }
 0xb15   :  { %v639_v58 = vpop.permute.xlu0 %638 }
 0xb16   :  { %v643_v59 = vpop.permute.xlu1 %642 }
 0xb17   :  { %v645_v60 = vsel %vm244_vm2, %v639_v58, %v643_v59 }
 0xb18   :  { %1390 = vmatmul.mubr.msk.f32.vlgmr.msra.gmra.mrb[10].mxu0 %vm246_vm3, %v645_v60 }
 0xb19   :  { %1528 = vmatpush1.bf16.msra.mxu0 %v1828_v25  ;;  %979 = vmatprep.mubr.f32.mxu0 %v1744_v43 }
 0xb1a   :  { %1530 = vmatprep.subr.bf16.mxu0 %v1830_v26 }
 0xb1d   :  { %1532 = vmatpush1.bf16.msra.mxu0 %v1835_v31 }
 0xb1e   :  { %1534 = vmatprep.subr.bf16.mxu0 %v1839_v32 }
 0xb21   :  { %1536 = vmatpush1.bf16.msra.mxu0 %v1843_v37 }
 0xb22   :  { %1538 = vmatprep.subr.bf16.mxu0 %v1847_v38 }
 0xb25   :  { %1540 = vmatpush1.bf16.msra.mxu0 %v1852_v42 }
 0xb26   :  { %1558 = vmatprep.subr.bf16.mxu0 %v1826_v21 }
 0xbeb   :  { %v715_v62 = vpop.f32.mrb[10].mxu0 }
 0xbec   :  { %v745_v63 = vadd.f32 %v715_v62, %v197_v61  ;;  %v717_v0 = vpop.f32.mrb[11].mxu0 }
 0xbed   :  { %v720_v1 = vadd.f32 %v1879_v49, %v717_v0 }
 0xbee   :  { %1643 = vtanh.f32 %v745_v63  ;;  %v1392_v5 = vmul.f32 -1.442695, %v745_v63 }
 0xbef   :  { %1645 = vtanh.f32 %v720_v1  ;;  %v1391_v6 = vmul.f32 -1.442695, %v720_v1 }
 0xbf0   :  { %1647 = vpow2.f32 %v1392_v5 }
 0xbf1   :  { %1649 = vpow2.f32 %v1391_v6 }
 0xbf8   :  { %v1644_v2 = vpop.eup %1643 }
 0xbf9   :  { %v1646_v3 = vpop.eup %1645  ;;  %755 = vrot.lane.b32.xlu1 %v1644_v2, %s1742_s1 }
 0xbfa   :  { %730 = vrot.lane.b32.xlu0 %v1646_v3, %s1742_s1  ;;  %v1648_v21 = vpop.eup %1647 }
 0xbfb   :  { %v1650_v7 = vpop.eup %1649  ;;  %v749_v29 = vadd.f32 1.0, %v1648_v21 }
 0xbfc   :  { %v724_v9 = vadd.f32 1.0, %v1650_v7 }
 0xbfd   :  { %1651 = vrcp.f32 %v749_v29 }
 0xbfe   :  { %1653 = vrcp.f32 %v724_v9 }
 0xc07   :  { %v1652_v11 = vpop.eup %1651 }
 0xc08   :  { %v1654_v10 = vpop.eup %1653  ;;  %v753_v15 = vmul.f32 %v1652_v11, %v630_v48 }
 0xc09   :  { %v728_v17 = vmul.f32 %v1654_v10, %v605_v51 }
 0xc6b   :  { %v756_v8 = vpop.permute.xlu1 %755 }
 0xc6c   :  { %v758_v12 = vmul.f32 %v1652_v11, %v756_v8  ;;  %v731_v13 = vpop.permute.xlu0 %730 }
 0xc6d   :  { %v733_v14 = vmul.f32 %v1654_v10, %v731_v13 }
 0xc6e   :  { %760 = vrot.lane.b32.xlu1 %v758_v12, %s1743_s2  ;;  %v207_v12 = vadd.f32 %v1816_v4, %v1930_v33 }
 0xc6f   :  { %735 = vrot.lane.b32.xlu0 %v733_v14, %s1743_s2 }
 0xce0   :  { %v761_v16 = vpop.permute.xlu1 %760 }
 0xce1   :  { %v763_v18 = vadd.f32 %v761_v16, %v753_v15  ;;  %v736_v19 = vpop.permute.xlu0 %735 }
 0xce2   :  { %v738_v20 = vadd.f32 %v736_v19, %v728_v17 }
 0xce3   :  { %1655 = vtanh.f32 %v763_v18 }
 0xce4   :  { %1657 = vtanh.f32 %v738_v20 }
 0xced   :  { %v1656_v22 = vpop.eup %1655 }
 0xcee   :  { %v1658_v23 = vpop.eup %1657  ;;  %766 = vrot.lane.b32.xlu1 %v1656_v22, %s1742_s1 }
 0xcef   :  { %741 = vrot.lane.b32.xlu0 %v1658_v23, %s1742_s1 }
 0xd60   :  { %v767_v27 = vpop.permute.xlu1 %766 }
 0xd61   :  { %v769_v24 = vmul.f32 %v1652_v11, %v767_v27  ;;  %v742_v34 = vpop.permute.xlu0 %741 }
 0xd62   :  { %v744_v35 = vmul.f32 %v1654_v10, %v742_v34 }
 0xd63   :  { %771 = vrot.lane.b32.xlu0 %v769_v24, %s1743_s2 }
 0xd64   :  { %775 = vrot.lane.b32.xlu1 %v744_v35, %s1742_s1 }
 0xdd5   :  { %v772_v36 = vpop.permute.xlu0 %771 }
 0xdd6   :  { %v776_v39 = vpop.permute.xlu1 %775 }
 0xdd7   :  { %v778_v40 = vsel %vm244_vm2, %v772_v36, %v776_v39 }
 0xdd8   :  { %1393 = vmatmul.mubr.msk.f32.vlgmr.msra.gmra.mrb[4].mxu1 %vm246_vm3, %v778_v40 }
 0xdd9   :  { %1544 = vmatpush1.bf16.msra.mxu1 %v1828_v25  ;;  %1112 = vmatprep.mubr.f32.mxu1 %v1744_v43 }
 0xdda   :  { %1546 = vmatprep.subr.bf16.mxu1 %v1830_v26 }
 0xddd   :  { %1548 = vmatpush1.bf16.msra.mxu1 %v1835_v31 }
 0xdde   :  { %1550 = vmatprep.subr.bf16.mxu1 %v1839_v32 }
 0xde1   :  { %1552 = vmatpush1.bf16.msra.mxu1 %v1843_v37 }
 0xde2   :  { %1554 = vmatprep.subr.bf16.mxu1 %v1847_v38 }
 0xde5   :  { %1556 = vmatpush1.bf16.msra.mxu1 %v1852_v42 }
 0xeab   :  { %v848_v44 = vpop.f32.mrb[4].mxu1 }
 0xeac   :  { %v878_v45 = vadd.f32 %v848_v44, %v202_v41  ;;  %v850_v46 = vpop.f32.mrb[5].mxu1 }
 0xead   :  { %v853_v47 = vadd.f32 %v1879_v49, %v850_v46 }
 0xeae   :  { %1659 = vtanh.f32 %v878_v45  ;;  %v1395_v51 = vmul.f32 -1.442695, %v878_v45 }
 0xeaf   :  { %1661 = vtanh.f32 %v853_v47  ;;  %v1394_v52 = vmul.f32 -1.442695, %v853_v47 }
 0xeb0   :  { %1663 = vpow2.f32 %v1395_v51 }
 0xeb1   :  { %1665 = vpow2.f32 %v1394_v52  ;;  %v212_v52 = vadd.f32 %v1928_v30, %v1816_v4 }
 0xeb8   :  { %v1660_v48 = vpop.eup %1659 }
 0xeb9   :  { %v1662_v50 = vpop.eup %1661  ;;  %888 = vrot.lane.b32.xlu1 %v1660_v48, %s1742_s1 }
 0xeba   :  { %863 = vrot.lane.b32.xlu0 %v1662_v50, %s1742_s1  ;;  %v1664_v53 = vpop.eup %1663 }
 0xebb   :  { %v1666_v54 = vpop.eup %1665  ;;  %v882_v28 = vadd.f32 1.0, %v1664_v53 }
 0xebc   :  { %v857_v55 = vadd.f32 1.0, %v1666_v54 }
 0xebd   :  { %1667 = vrcp.f32 %v882_v28 }
 0xebe   :  { %1669 = vrcp.f32 %v857_v55 }
 0xec7   :  { %v1668_v56 = vpop.eup %1667 }
 0xec8   :  { %v1670_v58 = vpop.eup %1669  ;;  %v886_v62 = vmul.f32 %v1668_v56, %v763_v18 }
 0xec9   :  { %v861_v0 = vmul.f32 %v1670_v58, %v738_v20 }
 0xf2b   :  { %v889_v57 = vpop.permute.xlu1 %888 }
 0xf2c   :  { %v891_v59 = vmul.f32 %v1668_v56, %v889_v57  ;;  %v864_v60 = vpop.permute.xlu0 %863 }
 0xf2d   :  { %v866_v61 = vmul.f32 %v1670_v58, %v864_v60 }
 0xf2e   :  { %893 = vrot.lane.b32.xlu1 %v891_v59, %s1743_s2 }
 0xf2f   :  { %868 = vrot.lane.b32.xlu0 %v866_v61, %s1743_s2 }
 0xfa0   :  { %v894_v63 = vpop.permute.xlu1 %893 }
 0xfa1   :  { %v896_v1 = vadd.f32 %v894_v63, %v886_v62  ;;  %v869_v2 = vpop.permute.xlu0 %868 }
 0xfa2   :  { %v871_v3 = vadd.f32 %v869_v2, %v861_v0 }
 0xfa3   :  { %1671 = vtanh.f32 %v896_v1 }
 0xfa4   :  { %1673 = vtanh.f32 %v871_v3 }
 0xfad   :  { %v1672_v5 = vpop.eup %1671 }
 0xfae   :  { %v1674_v6 = vpop.eup %1673  ;;  %899 = vrot.lane.b32.xlu1 %v1672_v5, %s1742_s1 }
 0xfaf   :  { %874 = vrot.lane.b32.xlu0 %v1674_v6, %s1742_s1 }
0x1020   :  { %v900_v21 = vpop.permute.xlu1 %899 }
0x1021   :  { %v902_v7 = vmul.f32 %v1668_v56, %v900_v21  ;;  %v875_v29 = vpop.permute.xlu0 %874 }
0x1022   :  { %v877_v9 = vmul.f32 %v1670_v58, %v875_v29 }
0x1023   :  { %904 = vrot.lane.b32.xlu0 %v902_v7, %s1743_s2 }
0x1024   :  { %908 = vrot.lane.b32.xlu1 %v877_v9, %s1742_s1 }
0x1095   :  { %v905_v11 = vpop.permute.xlu0 %904 }
0x1096   :  { %v909_v8 = vpop.permute.xlu1 %908 }
0x1097   :  { %v911_v10 = vsel %vm244_vm2, %v905_v11, %v909_v8 }
0x1098   :  { %1396 = vmatmul.mubr.msk.f32.vlgmr.msra.gmra.mrb[12].mxu0 %vm246_vm3, %v911_v10 }
0x1099   :  { %1560 = vmatpush1.bf16.msra.mxu0 %v1828_v25  ;;  %1245 = vmatprep.mubr.f32.mxu0 %v1744_v43 }
0x109a   :  { %1562 = vmatprep.subr.bf16.mxu0 %v1830_v26 }
0x109d   :  { %1564 = vmatpush1.bf16.msra.mxu0 %v1835_v31 }
0x109e   :  { %1566 = vmatprep.subr.bf16.mxu0 %v1839_v32 }
0x10a1   :  { %1568 = vmatpush1.bf16.msra.mxu0 %v1843_v37 }
0x10a2   :  { %1570 = vmatprep.subr.bf16.mxu0 %v1847_v38 }
0x10a5   :  { %1572 = vmatpush1.bf16.msra.mxu0 %v1852_v42 }
0x116b   :  { %v981_v13 = vpop.f32.mrb[12].mxu0 }
0x116c   :  { %v1011_v14 = vadd.f32 %v981_v13, %v207_v12  ;;  %v983_v25 = vpop.f32.mrb[13].mxu0 }
0x116d   :  { %v986_v15 = vadd.f32 %v1879_v49, %v983_v25 }
0x116e   :  { %1675 = vtanh.f32 %v1011_v14  ;;  %v1398_v32 = vmul.f32 -1.442695, %v1011_v14 }
0x116f   :  { %1677 = vtanh.f32 %v986_v15  ;;  %v1397_v37 = vmul.f32 -1.442695, %v986_v15 }
0x1170   :  { %1679 = vpow2.f32 %v1398_v32 }
0x1171   :  { %1681 = vpow2.f32 %v1397_v37 }
0x1178   :  { %v1676_v26 = vpop.eup %1675 }
0x1179   :  { %v1678_v31 = vpop.eup %1677  ;;  %1021 = vrot.lane.b32.xlu1 %v1676_v26, %s1742_s1 }
0x117a   :  { %996 = vrot.lane.b32.xlu0 %v1678_v31, %s1742_s1  ;;  %v1680_v38 = vpop.eup %1679 }
0x117b   :  { %v1682_v42 = vpop.eup %1681  ;;  %v1015_v33 = vadd.f32 1.0, %v1680_v38 }
0x117c   :  { %v990_v16 = vadd.f32 1.0, %v1682_v42 }
0x117d   :  { %1683 = vrcp.f32 %v1015_v33 }
0x117e   :  { %1685 = vrcp.f32 %v990_v16 }
0x1187   :  { %v1684_v17 = vpop.eup %1683 }
0x1188   :  { %v1686_v19 = vpop.eup %1685  ;;  %v1019_v27 = vmul.f32 %v1684_v17, %v896_v1 }
0x1189   :  { %v994_v34 = vmul.f32 %v1686_v19, %v871_v3 }
0x11eb   :  { %v1022_v18 = vpop.permute.xlu1 %1021 }
0x11ec   :  { %v1024_v20 = vmul.f32 %v1684_v17, %v1022_v18  ;;  %v997_v22 = vpop.permute.xlu0 %996 }
0x11ed   :  { %v999_v23 = vmul.f32 %v1686_v19, %v997_v22 }
0x11ee   :  { %1026 = vrot.lane.b32.xlu1 %v1024_v20, %s1743_s2 }
0x11ef   :  { %1001 = vrot.lane.b32.xlu0 %v999_v23, %s1743_s2 }
0x1260   :  { %v1027_v24 = vpop.permute.xlu1 %1026 }
0x1261   :  { %v1029_v35 = vadd.f32 %v1027_v24, %v1019_v27  ;;  %v1002_v36 = vpop.permute.xlu0 %1001  ;;  %v1277_v27 = vld [vmem:[%s2083_s5 + $0x8] sm:$0xff]  ;;  %v1278_v24 = vld [vmem:[%s2083_s5 + $0x10] sm:$0xff] }
0x1262   :  { %v1004_v39 = vadd.f32 %v1002_v36, %v994_v34  ;;  %v1745_v34 = vmov 0.0|0.0   ;;  %v1279_v36 = vld [vmem:[%s2083_s5 + $0x18] sm:$0xff] }
0x1263   :  { %1687 = vtanh.f32 %v1029_v35  ;;  %1573 = vmatprep.subr.bf16.mxu1 %v1745_v34 }
0x1264   :  { %1689 = vtanh.f32 %v1004_v39 }
0x126d   :  { %v1688_v40 = vpop.eup %1687 }
0x126e   :  { %v1690_v41 = vpop.eup %1689  ;;  %1032 = vrot.lane.b32.xlu1 %v1688_v40, %s1742_s1 }
0x126f   :  { %1007 = vrot.lane.b32.xlu0 %v1690_v41, %s1742_s1 }
0x12e0   :  { %v1033_v44 = vpop.permute.xlu1 %1032 }
0x12e1   :  { %v1035_v45 = vmul.f32 %v1684_v17, %v1033_v44  ;;  %v1008_v46 = vpop.permute.xlu0 %1007 }
0x12e2   :  { %v1010_v47 = vmul.f32 %v1686_v19, %v1008_v46  ;;  %v1404_v46 = vld [vmem:[#allocation2] ss:$0 sm:$0xff] }
0x12e3   :  { %1037 = vrot.lane.b32.xlu0 %v1035_v45, %s1743_s2 }
0x12e4   :  { %1041 = vrot.lane.b32.xlu1 %v1010_v47, %s1742_s1 }
0x1355   :  { %v1038_v48 = vpop.permute.xlu0 %1037 }
0x1356   :  { %v1042_v50 = vpop.permute.xlu1 %1041 }
0x1357   :  { %v1044_v51 = vsel %vm244_vm2, %v1038_v48, %v1042_v50 }
0x1358   :  { %1399 = vmatmul.mubr.msk.f32.vlgmr.msra.gmra.mrb[6].mxu1 %vm246_vm3, %v1044_v51 }
0x1359   :  { %1442 = vmatprep.mubr.msk.f32.mxu1 %vm1746_vm4, %v1744_v43 }
0x142b   :  { %v1114_v53 = vpop.f32.mrb[6].mxu1 }
0x142c   :  { %v1144_v54 = vadd.f32 %v1114_v53, %v212_v52  ;;  %v1116_v28 = vpop.f32.mrb[7].mxu1 }
0x142d   :  { %v1119_v55 = vadd.f32 %v1879_v49, %v1116_v28 }
0x142e   :  { %1691 = vtanh.f32 %v1144_v54  ;;  %v1401_v58 = vmul.f32 -1.442695, %v1144_v54 }
0x142f   :  { %1693 = vtanh.f32 %v1119_v55  ;;  %v1400_v59 = vmul.f32 -1.442695, %v1119_v55 }
0x1430   :  { %1695 = vpow2.f32 %v1401_v58 }
0x1431   :  { %1697 = vpow2.f32 %v1400_v59 }
0x1438   :  { %v1692_v56 = vpop.eup %1691 }
0x1439   :  { %v1694_v57 = vpop.eup %1693  ;;  %1154 = vrot.lane.b32.xlu1 %v1692_v56, %s1742_s1 }
0x143a   :  { %1129 = vrot.lane.b32.xlu0 %v1694_v57, %s1742_s1  ;;  %v1696_v60 = vpop.eup %1695 }
0x143b   :  { %v1698_v61 = vpop.eup %1697  ;;  %v1148_v4 = vadd.f32 1.0, %v1696_v60 }
0x143c   :  { %v1123_v30 = vadd.f32 1.0, %v1698_v61 }
0x143d   :  { %1699 = vrcp.f32 %v1148_v4 }
0x143e   :  { %1701 = vrcp.f32 %v1123_v30 }
0x1447   :  { %v1700_v62 = vpop.eup %1699 }
0x1448   :  { %v1702_v0 = vpop.eup %1701  ;;  %v1152_v5 = vmul.f32 %v1700_v62, %v1029_v35 }
0x1449   :  { %v1127_v21 = vmul.f32 %v1702_v0, %v1004_v39  ;;  %v1577_v39 = vpack.c.bf16 %v1279_v36, %v1278_v24 }
0x14ab   :  { %v1155_v63 = vpop.permute.xlu1 %1154 }
0x14ac   :  { %v1157_v1 = vmul.f32 %v1700_v62, %v1155_v63  ;;  %v1130_v2 = vpop.permute.xlu0 %1129 }
0x14ad   :  { %v1132_v3 = vmul.f32 %v1702_v0, %v1130_v2 }
0x14ae   :  { %1159 = vrot.lane.b32.xlu1 %v1157_v1, %s1743_s2 }
0x14af   :  { %1134 = vrot.lane.b32.xlu0 %v1132_v3, %s1743_s2 }
0x1520   :  { %v1160_v6 = vpop.permute.xlu1 %1159 }
0x1521   :  { %v1162_v7 = vadd.f32 %v1160_v6, %v1152_v5  ;;  %v1135_v29 = vpop.permute.xlu0 %1134 }
0x1522   :  { %v1137_v9 = vadd.f32 %v1135_v29, %v1127_v21 }
0x1523   :  { %1703 = vtanh.f32 %v1162_v7 }
0x1524   :  { %1705 = vtanh.f32 %v1137_v9 }
0x152d   :  { %v1704_v11 = vpop.eup %1703 }
0x152e   :  { %v1706_v8 = vpop.eup %1705  ;;  %1165 = vrot.lane.b32.xlu1 %v1704_v11, %s1742_s1 }
0x152f   :  { %1140 = vrot.lane.b32.xlu0 %v1706_v8, %s1742_s1 }
0x15a0   :  { %v1166_v10 = vpop.permute.xlu1 %1165 }
0x15a1   :  { %v1168_v12 = vmul.f32 %v1700_v62, %v1166_v10  ;;  %v1141_v13 = vpop.permute.xlu0 %1140 }
0x15a2   :  { %v1143_v14 = vmul.f32 %v1702_v0, %v1141_v13 }
0x15a3   :  { %1170 = vrot.lane.b32.xlu0 %v1168_v12, %s1743_s2 }
0x15a4   :  { %1174 = vrot.lane.b32.xlu1 %v1143_v14, %s1742_s1 }
0x1615   :  { %v1171_v25 = vpop.permute.xlu0 %1170 }
0x1616   :  { %v1175_v15 = vpop.permute.xlu1 %1174 }
0x1617   :  { %v1177_v26 = vsel %vm244_vm2, %v1171_v25, %v1175_v15 }
0x1618   :  { %1402 = vmatmul.mubr.msk.f32.vlgmr.msra.gmra.mrb[14].mxu0 %vm246_vm3, %v1177_v26 }
0x16eb   :  { %v1247_v31 = vpop.f32.mrb[14].mxu0 }
0x16ec   :  { %v1248_v32 = vpop.f32.mrb[15].mxu0 }
0x16ed   :  { %v1251_v37 = vadd.f32 %v1879_v49, %v1248_v32  ;;  %v1276_v49 = vld [vmem:[%s2083_s5] sm:$0xff] }
0x16ee   :  { %v1574_v35 = vpack.c.bf16 %v1277_v27, %v1276_v49 }
0x16ef   :  { %1707 = vtanh.f32 %v1251_v37  ;;  %v1403_v42 = vmul.f32 -1.442695, %v1251_v37 }
0x16f0   :  { %1575 = vmatpush3.bf16.msra.mxu1 %v1574_v35 }
0x16f1   :  { %1709 = vpow2.f32 %v1403_v42  ;;  %1576 = vmatprep.subr.bf16.mxu1 %v1745_v34 }
0x16f4   :  { %1578 = vmatpush3.bf16.msra.mxu1 %v1577_v39 }
0x16f9   :  { %v1708_v38 = vpop.eup %1707 }
0x16fa   :  { %1261 = vrot.lane.b32.xlu0 %v1708_v38, %s1742_s1 }
0x16fb   :  { %v1710_v33 = vpop.eup %1709 }
0x16fc   :  { %v1255_v16 = vadd.f32 1.0, %v1710_v33 }
0x16fe   :  { %1711 = vrcp.f32 %v1255_v16 }
0x1708   :  { %v1712_v17 = vpop.eup %1711 }
0x1709   :  { %v1259_v20 = vmul.f32 %v1712_v17, %v1137_v9 }
0x176c   :  { %v1262_v18 = vpop.permute.xlu0 %1261 }
0x176d   :  { %v1264_v19 = vmul.f32 %v1712_v17, %v1262_v18 }
0x176f   :  { %1266 = vrot.lane.b32.xlu1 %v1264_v19, %s1743_s2 }
0x17e1   :  { %v1267_v22 = vpop.permute.xlu1 %1266 }
0x17e2   :  { %v1269_v23 = vadd.f32 %v1267_v22, %v1259_v20 }
0x17e4   :  { %1713 = vtanh.f32 %v1269_v23 }
0x17ee   :  { %v1714_v40 = vpop.eup %1713 }
0x17ef   :  { %1272 = vrot.lane.b32.xlu0 %v1714_v40, %s1742_s1 }
0x1861   :  { %v1273_v41 = vpop.permute.xlu0 %1272 }
0x1862   :  { %v1275_v44 = vmul.f32 %v1712_v17, %v1273_v41 }
0x1864   :  { %1288 = vrot.lane.b32.xlu1 %v1275_v44, %s1743_s2 }
0x18d6   :  { %v1289_v45 = vpop.permute.xlu1 %1288 }
0x18d7   :  { %1443 = vmatmul.mubr.msk.f32.vlgmr.msra.gmra.mrb[8].mxu1 %vm244_vm2, %v1289_v45 }
0x19aa   :  { %v1358_v47 = vpop.f32.mrb[8].mxu1 }
0x19ab   :  { %v1359_v48 = vadd.f32 %v1404_v46, %v1358_v47  ;;  %v1444_v50 = vpop.f32.mrb[9].mxu1 }
0x19ad   :  { %1363 = vst.msk [vmem:[%s2085_s7] sm:$0xff] %vm1362_vm5, %v1359_v48 }
0x19ae   :  { %1368 = vsyncpa [#allocation4], 1 }

</bundles_post_ra>
